<compile_context>
chip_gen: v6e
topology: v6e:2x2x1
jax: 0.10.0
libtpu: 0.0.40
codegen_flags: <defaults>
</compile_context>

<pallas_src>
import jax
import jax.numpy as jnp
from jax import lax
from jax.experimental import pallas as pl
from jax.experimental.pallas import tpu as pltpu


# ------------------------------ tile selection ------------------------------

def _vmem_capacity_bytes() -> int:
    """Physical VMEM of the local chip (128 MiB v5e/v6e, 64 MiB v7x)."""
    try:
        return int(pltpu.get_tpu_info().vmem_capacity_bytes)
    except Exception:
        return 64 << 20  # conservative fallback (v7x per-TensorCore figure)


def _pick_hw_tile(hw: int, bytes_per_col: int, *, max_tile: int,
                  vmem_budget: int, n_batch: int, min_total_blocks: int = 2) -> int:
    """128-aligned spatial tile whose double-buffered blocks fit `vmem_budget`.

    Also shrinks the tile (down to 128) so that n_batch * cdiv(hw, t) >=
    min_total_blocks when achievable, keeping both v7x TensorCores busy.
    """
    if hw <= 128:
        return hw  # full extent (allowed even when not 128-aligned)
    t_cap = max(128, vmem_budget // (2 * bytes_per_col))  # x2: double buffering
    t = min(max_tile, hw, t_cap)
    t -= t % 128
    t = max(t, 128)
    while t > 128 and n_batch * pl.cdiv(hw, t) < min_total_blocks:
        t -= 128
    return t


# ----------------------- kernel 1: channel mean / max -----------------------

def _mean_max_kernel(x_ref, o_ref):
    # x_ref: (nb, Cx, T) f32 ; o_ref: (nb, 2, T) f32 (row 0 = mean, row 1 = max)
    xv = x_ref[...]
    o_ref[:, 0:1, :] = jnp.mean(xv, axis=1, keepdims=True)
    o_ref[:, 1:2, :] = jnp.max(xv, axis=1, keepdims=True)


def channel_mean_max(x_flat):
    """x_flat: (N, Cx, HW) f32 -> (N, 2, HW) f32 (channel mean, channel max)."""
    n, cx, hw = x_flat.shape
    cap = _vmem_capacity_bytes()
    budget = min(cap // 4, 32 << 20)
    t = _pick_hw_tile(hw, (cx + 2) * 4, max_tile=16384, vmem_budget=budget,
                      n_batch=n)
    n_spatial = pl.cdiv(hw, t)

    # Group batch images per step when the spatial block is tiny (kernel 1 is
    # per-step-overhead bound for small Cx), but never collapse the grid below
    # 2 blocks when >=2 were available (v7x megacore).
    nb = 1
    for cand in range(1, n + 1):
        if n % cand:
            continue
        if cand * (cx + 2) * t * 4 > (4 << 20):
            continue
        if (n // cand) * n_spatial < 2 and n * n_spatial >= 2:
            continue
        nb = cand

    return pl.pallas_call(
        _mean_max_kernel,
        out_shape=jax.ShapeDtypeStruct((n, 2, hw), jnp.float32),
        grid=(n // nb, n_spatial),
        in_specs=[pl.BlockSpec((nb, cx, t), lambda b, s: (b, 0, s))],
        out_specs=pl.BlockSpec((nb, 2, t), lambda b, s: (b, 0, s)),
        compiler_params=pltpu.CompilerParams(
            dimension_semantics=("parallel", "parallel")),
    )(x_flat)


# -------- kernel 2: fused sigmoid + attention-apply + 1x1 conv (MXU) --------

def _apply_attn_conv_kernel(w_ref, y_ref, l_ref, o_ref):
    # w_ref: (c2, c1) f32 — 1x1 conv weight, resident across the grid
    # y_ref: (c1, T)  f32 — y slab (NCHW layout, spatial on lanes)
    # l_ref: (1,  T)  f32 — 7x7-conv logits for this slab (pre-sigmoid)
    # o_ref: (c2, T)      — lane-dense output block (T multiple of 128)
    #
    # W @ (Y * s) == (W @ Y) * s  (s is a per-column scalar), so the matmul runs
    # on raw f32 Y and the scale hits the f32 accumulator → near-f32 accuracy.
    acc = jnp.dot(w_ref[...], y_ref[...],
                  preferred_element_type=jnp.float32,
                  precision=lax.Precision.HIGHEST)          # MXU slack is huge here
    scale = 1.0 + jax.nn.sigmoid(l_ref[...])                # EUP: free bundle slot
    o_ref[...] = (acc * scale).astype(o_ref.dtype)


def apply_attn_and_pointwise_conv(y_flat, logits_flat, w, out_dtype=jnp.float32):
    """y_flat: (N, c1, HW) f32; logits_flat: (N, 1, HW) f32; w: (c2, c1) f32.

    Returns (N, c2, HW) == Conv2d(c1, c2, 1, bias=False)(y * (1 + sigmoid(logits))).
    """
    n, c1, hw = y_flat.shape
    c2 = w.shape[0]
    cap = _vmem_capacity_bytes()
    budget = min(cap // 3, 48 << 20)
    bytes_per_col = (c1 + 1 + c2) * 4
    t = _pick_hw_tile(hw, bytes_per_col, max_tile=8192, vmem_budget=budget,
                      n_batch=n)
    n_spatial = pl.cdiv(hw, t)

    flops = 2 * n * hw * c1 * c2 + 2 * n * hw * c2
    bytes_accessed = (y_flat.size + logits_flat.size + w.size) * 4 \
        + n * c2 * hw * jnp.dtype(out_dtype).itemsize
    vmem_limit = int(min(cap * 3 // 4,
                         2 * bytes_per_col * t + w.size * 4 + (32 << 20)))

    return pl.pallas_call(
        _apply_attn_conv_kernel,
        out_shape=jax.ShapeDtypeStruct((n, c2, hw), out_dtype),
        grid=(n, n_spatial),
        in_specs=[
            pl.BlockSpec((c2, c1), lambda b, s: (0, 0)),           # weight: resident
            pl.BlockSpec((None, c1, t), lambda b, s: (b, 0, s)),   # y slab
            pl.BlockSpec((None, 1, t), lambda b, s: (b, 0, s)),    # logits slab
        ],
        out_specs=pl.BlockSpec((None, c2, t), lambda b, s: (b, 0, s)),
        compiler_params=pltpu.CompilerParams(
            dimension_semantics=("parallel", "parallel"),
            vmem_limit_bytes=vmem_limit),
        cost_estimate=pl.CostEstimate(
            flops=flops, transcendentals=n * hw, bytes_accessed=bytes_accessed),
    )(w, y_flat, logits_flat)


# -------------------------------- SWM forward --------------------------------

def swm_forward(x, y, cv1_weight, conv_weight):
    """SWM.forward((x, y)).

    x: (N, Cx, H, W) f32   — source of the spatial attention
    y: (N, c1, H, W) f32   — tensor the attention is applied to
    cv1_weight:  (1, 2, 7, 7) f32
    conv_weight: (c2, c1, 1, 1) f32
    returns (N, c2, H, W) f32
    """
    n, cx, h, w_ = x.shape
    _, c1, _, _ = y.shape
    c2 = conv_weight.shape[0]
    hw = h * w_

    # 1) channel mean / max pooling of x (Pallas kernel).
    pooled = channel_mean_max(x.reshape(n, cx, hw)).reshape(n, 2, h, w_)

    # 2) 7x7 conv (2 -> 1 channels): ~98 MAC/pixel, negligible; left to XLA.
    #    Sigmoid is NOT applied here — it is fused into kernel 3.
    # TODO(synk): fold the pooled->7x7 chain into a Pallas kernel with halo DMA
    # if it ever shows up in profiles (it is the last remaining HBM round trip).
    logits = lax.conv_general_dilated(
        pooled, cv1_weight, window_strides=(1, 1),
        padding=[(3, 3), (3, 3)],
        dimension_numbers=("NCHW", "OIHW", "NCHW"),
        precision=lax.Precision.HIGHEST)                     # (N, 1, H, W)

    # 3) fused sigmoid + y*(1+atten) + 1x1 conv (Pallas MXU kernel, hot path).
    out = apply_attn_and_pointwise_conv(
        y.reshape(n, c1, hw),
        logits.reshape(n, 1, hw),
        conv_weight.reshape(c2, c1))
    return out.reshape(n, c2, h, w_)


# ------------------------------------ main -----------------------------------

if __name__ == "__main__":
    key = jax.random.PRNGKey(0)
    kx, ky, k1, k2 = jax.random.split(key, 4)

    # Small shapes consistent with the module: SWM(c1=4, c2=8), 16x16 maps.
    N, CX, C1, C2, H, W = 2, 4, 4, 8, 16, 16

    x = jax.random.normal(kx, (N, CX, H, W), jnp.float32)
    y = jax.random.normal(ky, (N, C1, H, W), jnp.float32)

    # Deterministic Conv2d-style inits (uniform kaiming bound), no bias.
    b1 = 1.0 / (2 * 7 * 7) ** 0.5
    cv1_w = jax.random.uniform(k1, (1, 2, 7, 7), jnp.float32, -b1, b1)
    b2 = 1.0 / C1 ** 0.5
    conv_w = jax.random.uniform(k2, (C2, C1, 1, 1), jnp.float32, -b2, b2)

    out = swm_forward(x, y, cv1_w, conv_w)
    out = jax.block_until_ready(out)

    # ---- reference (pure XLA, full-precision) ----
    mean = jnp.mean(x, axis=1, keepdims=True)
    mx = jnp.max(x, axis=1, keepdims=True)
    att_ref = jax.nn.sigmoid(lax.conv_general_dilated(
        jnp.concatenate([mean, mx], axis=1), cv1_w, (1, 1),
        [(3, 3), (3, 3)], dimension_numbers=("NCHW", "OIHW", "NCHW"),
        precision=lax.Precision.HIGHEST))
    y1_ref = y * att_ref + y
    ref = lax.conv_general_dilated(
        y1_ref, conv_w, (1, 1), [(0, 0), (0, 0)],
        dimension_numbers=("NCHW", "OIHW", "NCHW"),
        precision=lax.Precision.HIGHEST)

    assert out.shape == ref.shape, (out.shape, ref.shape)
    # HIGHEST-precision MXU + post-matmul f32 scale -> near-f32 accuracy.
    assert jnp.allclose(out, ref, atol=1e-3, rtol=1e-3), (
        float(jnp.max(jnp.abs(out - ref))))

    print("KERNEL_OK")
</pallas_src>

<mosaic_0001>
module attributes {stable_mosaic.version = 11 : i64} {
  func.func @_mean_max_kernel(%arg0: i32, %arg1: i32, %arg2: memref<1x4x256xf32, #tpu.memory_space<vmem>>, %arg3: memref<1x2x256xf32, #tpu.memory_space<vmem>>) attributes {dimension_semantics = [#tpu.dimension_semantics<parallel>, #tpu.dimension_semantics<parallel>], iteration_bounds = array<i64: 2, 1>, scalar_prefetch = 0 : i64, scratch_operands = 0 : i64, tpu.core_type = #tpu.core_type<tc>, window_params = [{transform_indices = @transform_0, window_bounds = array<i64: 1, 4, 256>}, {transform_indices = @transform_1, window_bounds = array<i64: 1, 2, 256>}]} {
    %c0 = arith.constant 0 : index
    %c0_0 = arith.constant 0 : index
    %c0_1 = arith.constant 0 : index
    %0 = vector.load %arg2[%c0, %c0_0, %c0_1] : memref<1x4x256xf32, #tpu.memory_space<vmem>>, vector<1x4x256xf32>
    %cst = arith.constant dense<0.000000e+00> : vector<1x256xf32>
    %1 = vector.multi_reduction <add>, %0, %cst [1] : vector<1x4x256xf32> to vector<1x256xf32>
    %2 = vector.shape_cast %1 : vector<1x256xf32> to vector<1x1x256xf32>
    %cst_2 = arith.constant 4.000000e+00 : f32
    %3 = vector.broadcast %cst_2 : f32 to vector<1x1x256xf32>
    %4 = arith.divf %2, %3 : vector<1x1x256xf32>
    %c0_3 = arith.constant 0 : index
    %c0_4 = arith.constant 0 : index
    %c0_5 = arith.constant 0 : index
    %5 = vector.load %arg3[%c0_3, %c0_4, %c0_5] : memref<1x2x256xf32, #tpu.memory_space<vmem>>, vector<1x1x256xf32>
    tpu.vector_store %arg3[%c0_3, %c0_4, %c0_5], %4 {strides = array<i32>} : memref<1x2x256xf32, #tpu.memory_space<vmem>>, vector<1x1x256xf32>,
    %cst_6 = arith.constant dense<0xFF800000> : vector<1x256xf32>
    %6 = vector.multi_reduction <maximumf>, %0, %cst_6 [1] : vector<1x4x256xf32> to vector<1x256xf32>
    %7 = vector.shape_cast %6 : vector<1x256xf32> to vector<1x1x256xf32>
    %c0_7 = arith.constant 0 : index
    %c1 = arith.constant 1 : index
    %c0_8 = arith.constant 0 : index
    %8 = vector.load %arg3[%c0_7, %c1, %c0_8] : memref<1x2x256xf32, #tpu.memory_space<vmem>>, vector<1x1x256xf32>
    tpu.vector_store %arg3[%c0_7, %c1, %c0_8], %7 {strides = array<i32>} : memref<1x2x256xf32, #tpu.memory_space<vmem>>, vector<1x1x256xf32>,
    return
  }
  func.func @transform_0(%arg0: i32, %arg1: i32) -> (i32, i32, i32) {
    %c0_i32 = arith.constant 0 : i32
    %c0_i32_0 = arith.constant 0 : i32
    return %arg0, %c0_i32, %arg1 : i32, i32, i32
  }
  func.func @transform_1(%arg0: i32, %arg1: i32) -> (i32, i32, i32) {
    %c0_i32 = arith.constant 0 : i32
    %c0_i32_0 = arith.constant 0 : i32
    return %arg0, %c0_i32, %arg1 : i32, i32, i32
  }
}

</mosaic_0001>

<bundles_post_ra>
// kernel: tpu_custom_call.1
= control target key start
LH: loop header
LB: loop body
LE: loop exit
PB: predicated region body
PF: predicated region fallthrough
CT: control target
= control target key end

     0   :  { %6 = vsyncpa [#allocation3], 0  ;;  %s679_s0 = inlined_call_operand.hbm [shape: f32[2,4,256], index: 0, kind: input, shape index: {}]   ;;  %s680_s1 = inlined_call_operand.hbm [shape: f32[2,2,256], index: 1, kind: output, shape index: {}]  }
   0x1   :  { %8 = vsyncpa [#allocation3 + $0x1], 0 }
   0x2   :  { %9 = vsyncpa [#allocation4], 0 }
   0x3   :  { %11 = vsyncpa [#allocation4 + $0x1], 0  ;;  %s538_s6 = smov 0   ;;  %s540_s7 = smov 0  }
   0x4   :  { %s542_s8 = smov 0   ;;  %s544_s9 = smov 0  }
   0x5   :  { %s546_s10 = smov 0   ;;  %s548_s11 = smov 0  }
   0x6 LB: > { %s333_s12 = sadd.s32 4294967295, %s523_s11   ;;  %s334_s13 = sadd.s32 4294967294, %s523_s11   ;;  %s523_s11 = sphi %s548_s11, %s17_s11   ;;  %s519_s10 = sphi %s546_s10, %s692_s10   ;;  %s515_s9 = sphi %s544_s9, %s691_s9   ;;  %s511_s8 = sphi %s542_s8, %s690_s8   ;;  %s507_s7 = sphi %s540_s7, %s689_s7   ;;  %s503_s6 = sphi %s538_s6, %s688_s6  }
   0x7   : > { %s29_s14 = sadd.s32 1, %s519_s10  ;;  %s38_s15 = sadd.s32 1, %s511_s8 }
   0x8   : > { %p31_p0 = scmp.ge.s32.totalorder %s29_s14, 2  ;;  %p45_p1 = scmp.ne.s32.totalorder %s511_s8, %s507_s7 }
   0x9   : > { %p46_p2 = scmp.eq.s32.totalorder %s523_s11, 0  ;;  %p51_p3 = scmp.ne.s32.totalorder %s507_s7, %s503_s6 }
   0xa   : > { %s694_s14 = smov (%p31_p0, %s29_s14), 0  ;;  %p52_p5 = scmp.eq.s32.totalorder %s333_s12, 0 }
   0xb   : > { %p579_p4 = por %p46_p2, %p45_p1  ;;  %s33_s17 = ssub.s32 %s519_s10, %s694_s14 }
   0xc   : > { %p77_p6 = scmp.eq.s32.totalorder %s333_s12, 1  ;;  %p36_p7 = scmp.eq.s32.totalorder %s33_s17, 0 }
   0xd   : > { %p585_p8 = por %p52_p5, %p51_p3  ;;  %p83_p10 = scmp.eq.s32.totalorder %s334_s13, 1 }
   0xe   : > { %p589_p9 = por %p77_p6, %p45_p1  ;;  %p363_p13 = scmp.lt.s32.totalorder %s523_s11, 2 }
   0xf   : > { %s594_s20 = scalar_select %p36_p7, %s511_s8, %s38_s15  }
  0x10   : > { %p596_p11 = por %p83_p10, %p51_p3  ;;  %s103_s22 = sand.u32 1, %s511_s8  }
  0x11   : > { %s337_s23 = sshll.u32 %s103_s22, 3  ;;  %s349_s24 = sshll.u32 %s519_s10, 7 }
  0x12   : > { %s684_s21 = scalar_select %p596_p11, 1, 0 }
  0x13   : > { %s115_s27 = scalar_lea.hbm %s679_s0, %s349_s24  ;;  %s107_s28 = scalar_lea.vmem [#allocation2], %s337_s23 }
  0x14   : > { %s117_s29 = sshll.u32 %s107_s28, 4  ;;  %p609_p0 = pnand %p363_p13, %p579_p4  ;;  %s118_s29 = int_to_ptr.vmem [resolvable:$true] %s117_s29 }
  0x15   : > { %p340_p1 = scmp.ge.s32.totalorder %s523_s11, 1  ;;  %p122_p2 = scmp.lt.s32.totalorder %s523_s11, 3 }
  0x16   : > { %s104_s2 = scalar_lea.sflag [#allocation3], %s103_s22  ;;  %p417_p3 = pneg %p609_p0 }
  0x17   : > { %s428_s3 = scalar_lea.vmem %s118_s29, 128  ;;  %s525_s4 = smov [#allocation2]  }
  0x18   : > { %p429_p5 = scmp.ne.s32.totalorder %s118_s29, %s428_s3  ;;  %s433_s5 = sshll.u32 %s525_s4, 4  ;;  %s434_s5 = int_to_ptr.vmem [resolvable:$false] %s433_s5 }
  0x19   : > { %s435_s12 = scalar_lea.vmem %s434_s5, 256  ;;  %p436_p10 = scmp.lt.s32.totalorder %s118_s29, %s434_s5 }
  0x1a   : > { %p431_p6 = pnand %p429_p5, %p417_p3  ;;  %p437_p12 = scmp.lt.s32.totalorder %s435_s12, %s428_s3 }
  0x1c   : > { %p432_p7 = pneg %p431_p6  ;;  %p438_p4 = por %p437_p12, %p436_p10 }
  0x1e   : > { %p439_p13 = pnand %p438_p4, %p432_p7 }
  0x20   : > { %442 = shalt.err (!%p439_p13)
}
  0x21   : > { %358 = dma.hbm_to_vmem [thread:$0]  (!%p609_p0), %s115_s27, 128, %s118_s29, %s104_s2  }
  0x22   : > { %p123_p11 = pnand %p340_p1, %p122_p2 }
  0x23   : > { %s624_s13 = sand.u32 (!%p123_p11), 1, %s507_s7  }
  0x24   : > { %126 = sbr.rel (%p123_p11) target bundleno = 79 (0x4f), region = 24  ;;  %s341_s15 = sshll.u32 (!%p123_p11), %s624_s13, 3 }
  0x25   : > { %s129_s16 = scalar_lea.sflag (!%p123_p11), [#allocation3], %s624_s13  ;;  %s132_s17 = scalar_lea.vmem (!%p123_p11), [#allocation2], %s341_s15 }
  0x29   : > { %494 = dma.done.wait (%p585_p8), %s129_s16, 128  }
  0x2a   : > { %496 = vsyncadd (%p585_p8), %s129_s16, 4294967168  ;;  %vm157_vm0 = vcmask 1043456   ;;  %v153_v0 = vld [vmem:[%s132_s17] sm:$0xff]  ;;  %v526_v12 = vmov 1966171168   ;;  %v181_v14 = vlaneseq  ;;  %s342_s18 = sshll.u32 %s624_s13, 2 }
  0x2b   : > { %v155_v1 = vcombine.high %v153_v0, %v153_v0  ;;  %v158_v2 = vsel %vm157_vm0, %v153_v0, 0.0  ;;  %v198_v3 = vsel %vm157_vm0, %v153_v0, -inf  ;;  %v179_v13 = vunpack.c.l.s4 %v526_v12  ;;  %s150_s22 = scalar_lea.vmem [#allocation5], %s342_s18  ;;  %s350_s24 = sshll.u32 %s515_s9, 6 }
  0x2c   : > { %v159_v4 = vrot.slane %v158_v2, 4  ;;  %v199_v5 = vrot.slane %v198_v3, 4  ;;  %v182_v24 = vshrl.u32 %v181_v14, 7  ;;  %vm195_vm1 = vcmp.lt.s32.totalorder %v181_v14, 256  ;;  %s249_s23 = sshll.u32 %s150_s22, 4  ;;  %s247_s27 = scalar_lea.hbm %s680_s1, %s350_s24  ;;  %s634_s23 = int_to_ptr.vmem [resolvable:$true] %s249_s23 }
  0x2d   : > { %v165_v6 = vsel %vm157_vm0, %v155_v1, 0.0  ;;  %v205_v7 = vsel %vm157_vm0, %v155_v1, -inf  ;;  %v180_v23 = vunpack.c.0.s8 %v179_v13  ;;  %s233_s28 = scalar_lea.sflag [#allocation4], %s624_s13  ;;  %s443_s29 = scalar_lea.vmem %s634_s23, 64 }
  0x2e   : > { %v160_v8 = vadd.f32 %v159_v4, %v158_v2  ;;  %v166_v9 = vrot.slane %v165_v6, 4  ;;  %v200_v10 = vmax.f32 %v198_v3, %v199_v5  ;;  %v206_v11 = vrot.slane %v205_v7, 4  ;;  %p444_p8 = scmp.ne.s32.totalorder %s634_s23, %s443_s29  ;;  %s527_s9 = smov [#allocation5]  }
  0x2f   : > { %v183_v35 = vsub.s32 %v180_v23, %v182_v24  ;;  %s447_s30 = sshll.u32 %s527_s9, 4  ;;  %s448_s30 = int_to_ptr.vmem [resolvable:$false] %s447_s30 }
  0x30   : > { %v161_v15 = vrot.slane %v160_v8, 2  ;;  %v167_v16 = vadd.f32 %v166_v9, %v165_v6  ;;  %v201_v17 = vrot.slane %v200_v10, 2  ;;  %v207_v18 = vmax.f32 %v205_v7, %v206_v11  ;;  %p445_p11 = pnand %p444_p8, %p589_p9  ;;  %s449_s2 = scalar_lea.vmem %s448_s30, 128 }
  0x31   : > { %p450_p0 = scmp.lt.s32.totalorder %s634_s23, %s448_s30  ;;  %p451_p1 = scmp.lt.s32.totalorder %s449_s2, %s443_s29 }
  0x32   : > { %v162_v19 = vadd.f32 %v161_v15, %v160_v8  ;;  %v168_v20 = vrot.slane %v167_v16, 2  ;;  %v202_v21 = vmax.f32 %v200_v10, %v201_v17  ;;  %v208_v22 = vrot.slane %v207_v18, 2  ;;  %p446_p12 = pneg %p445_p11 }
  0x33   : > { %p452_p2 = por %p451_p1, %p450_p0 }
  0x34   : > { %v163_v25 = vrot.slane %v162_v19, 1  ;;  %v169_v26 = vadd.f32 %v168_v20, %v167_v16  ;;  %v203_v27 = vrot.slane %v202_v21, 1  ;;  %v209_v28 = vmax.f32 %v207_v18, %v208_v22 }
  0x35   : > { %p453_p3 = pnand %p452_p2, %p446_p12 }
  0x36   : > { %v164_v29 = vadd.f32 %v163_v25, %v162_v19  ;;  %v170_v30 = vrot.slane %v169_v26, 1  ;;  %v204_v31 = vmax.f32 %v202_v21, %v203_v27  ;;  %v210_v32 = vrot.slane %v209_v28, 1 }
  0x38   : > { %v171_v33 = vadd.f32 %v170_v30, %v169_v26  ;;  %v173_v34 = vmul.f32 0.25, %v164_v29  ;;  %v211_v36 = vmax.f32 %v209_v28, %v210_v32 }
  0x3a   : > { %v174_v37 = vmul.f32 0.25, %v171_v33  ;;  %v214_v38 = vcombine.low %v204_v31, %v211_v36 }
  0x3c   : > { %v177_v39 = vcombine.low %v173_v34, %v174_v37  ;;  %v221_v40 = vrot.slane %v214_v38, %v183_v35 }
  0x3e   : > { %v184_v41 = vrot.slane %v177_v39, %v183_v35  ;;  %v228_v42 = vrot.slane %v221_v40, %v183_v35 }
  0x40   : > { %v191_v43 = vrot.slane %v184_v41, %v183_v35  ;;  %343 = vst.msk [vmem:[%s150_s22 + $0x1] ss:$2 sm:$0x3] %vm195_vm1, %v228_v42 }
  0x42   : > { %197 = vst.msk [vmem:[%s150_s22] ss:$2 sm:$0x3] %vm195_vm1, %v191_v43 }
  0x43   : > { %456 = shalt.err (!%p453_p3)
}
  0x44   : > { %s457_s3 = scalar_lea.hbm %s247_s27, 64  ;;  %s461_s12 = scalar_lea.hbm %s680_s1, 128 }
  0x45   : > { %p458_p5 = scmp.ne.s32.totalorder %s247_s27, %s457_s3  ;;  %p462_p10 = scmp.lt.s32.totalorder %s247_s27, %s680_s1 }
  0x46   : > { %p463_p4 = scmp.lt.s32.totalorder %s461_s12, %s457_s3 }
  0x47   : > { %p459_p6 = pnand %p458_p5, %p589_p9 }
  0x48   : > { %p464_p13 = por %p463_p4, %p462_p10 }
  0x49   : > { %p460_p7 = pneg %p459_p6 }
  0x4b   : > { %p465_p8 = pnand %p464_p13, %p460_p7 }
  0x4d   : > { %468 = shalt.err (!%p465_p8)
}
  0x4e   : > { %353 = dma.vmem_to_hbm [thread:$0]  (%p589_p9), %s634_s23, 64, %s247_s27, %s233_s28  }
  0x4f PF: > { %s261_s16 = sand.u32 1, %s503_s6   ;;  %p686_p11 = scmp.ne.s32.totalorder %s684_s21, 0 }
  0x50   : > { %p687_p12 = scmp.ge.s32.totalorder %s523_s11, 2  ;;  %s262_s17 = scalar_lea.sflag [#allocation4], %s261_s16 }
  0x52   : > { %p360_p0 = pnand %p687_p12, %p686_p11 }
  0x54   : > { %p361_p1 = pneg %p360_p0 }
  0x56   : > { %498 = dma.done.wait (%p361_p1), %s262_s17, 64  }
  0x57   : > { %500 = vsyncadd (%p361_p1), %s262_s17, 4294967232  ;;  %s17_s11 = sadd.s32 1, %s523_s11   ;;  %s688_s6 = smov %s507_s7 }
  0x58   : > { %p14_p2 = scmp.ge.s32.totalorder %s17_s11, 4   ;;  %s689_s7 = smov %s511_s8 }
  0x59   : > { %s690_s8 = smov %s594_s20  ;;  %s691_s9 = smov %s519_s10 }
  0x5a   : > { %s692_s10 = smov %s694_s14  ;;  %16 = sbr.rel (!%p14_p2) target bundleno = 6 (0x6), region = 70 }
  0x5f   :  { %267 = vsyncpa [#allocation3], 1 }
  0x60   :  { %269 = vsyncpa [#allocation3 + $0x1], 1 }
  0x61   :  { %270 = vsyncpa [#allocation4], 1 }
  0x62   :  { %272 = vsyncpa [#allocation4 + $0x1], 1 }

</bundles_post_ra>
